<compile_context>
chip_gen: v6e
topology: v6e:2x2x1
jax: 0.10.0
libtpu: 0.0.40
codegen_flags: <defaults>
</compile_context>

<pallas_src>
import jax
import jax.numpy as jnp
from jax.experimental import pallas as pl
from jax.experimental.pallas import tpu as pltpu


def _round_up(x, m):
    return ((x + m - 1) // m) * m


def _dp_module_kernel(x_ref, w_ref, b_ref, o_ref, acc_ref):
    """One (M, N) output tile of the replicated module: tanh(x @ w + b).

    Grid = (m_tiles, n_tiles, k_tiles); K (reduction) is last / "arbitrary".

    x_ref:   (bm, bk)   batch-chunk slice of the scattered input (dim 0)
    w_ref:   (bk, bn)   replicated module weight tile
    b_ref:   (1, bn)    replicated module bias tile
    o_ref:   (bm, bn)   this chunk's slice of the gathered output (dim 0)
    acc_ref: (bm, bn)   f32 VMEM accumulator, resident across the K axis
    """
    k = pl.program_id(2)

    @pl.when(k == 0)
    def _init():
        acc_ref[...] = jnp.zeros_like(acc_ref)

    x = x_ref[...]
    w = w_ref[...]
    # bf16 operands for the MXU fast path; accumulate in f32.
    if x.dtype != jnp.bfloat16:
        x = x.astype(jnp.bfloat16)
    if w.dtype != jnp.bfloat16:
        w = w.astype(jnp.bfloat16)
    acc_ref[...] += jnp.dot(x, w, preferred_element_type=jnp.float32)

    @pl.when(k == pl.num_programs(2) - 1)
    def _finalize():
        # bias + tanh once, in f32 (VPU add; tanh on the EUP slot).
        y = acc_ref[...] + b_ref[...].astype(jnp.float32)
        o_ref[...] = jnp.tanh(y).astype(o_ref.dtype)


def data_parallel_forward(x, w, b, *, block_m=256, block_n=256, block_k=256):
    """Pallas equivalent of _DataParallel(module).forward(x).

    The DataParallel scatter/gather along dim 0 is the leading "parallel"
    M grid axis; module params are replicated to every grid step via their
    BlockSpecs.  Tile sizes are MXU/VMEM-driven (256-aligned by default,
    fine on v5e since 256 is a multiple of 128), never len(device_ids).
    """
    n, f_in = x.shape
    f_in_w, f_out = w.shape
    assert f_in_w == f_in
    assert b.shape == (1, f_out)

    # Tile sizes from hardware geometry; shrink only if the problem is smaller.
    bm = block_m if n >= block_m else _round_up(n, 8)
    bn = block_n if f_out >= block_n else _round_up(f_out, 128)
    bk = block_k if f_in >= block_k else _round_up(f_in, 128)

    # Pad to tile multiples (lane-dense, (8,128)-aligned blocks). Zero K/M/N
    # padding is exact for the matmul; padded rows/cols are sliced off below.
    n_pad = _round_up(n, bm)
    k_pad = _round_up(f_in, bk)
    o_pad = _round_up(f_out, bn)
    if (n_pad, k_pad) != (n, f_in):
        x = jnp.pad(x, ((0, n_pad - n), (0, k_pad - f_in)))
    if (k_pad, o_pad) != (f_in, f_out):
        w = jnp.pad(w, ((0, k_pad - f_in), (0, o_pad - f_out)))
    if o_pad != f_out:
        b = jnp.pad(b, ((0, 0), (0, o_pad - f_out)))

    grid = (n_pad // bm, o_pad // bn, k_pad // bk)

    out = pl.pallas_call(
        _dp_module_kernel,
        out_shape=jax.ShapeDtypeStruct((n_pad, o_pad), x.dtype),
        grid_spec=pltpu.PrefetchScalarGridSpec(
            num_scalar_prefetch=0,
            grid=grid,
            in_specs=[
                # scatter: batch chunk i gets rows [i*bm, (i+1)*bm)
                pl.BlockSpec((bm, bk), lambda i, j, k: (i, k)),
                # replicate: every chunk sees the (tiled) module weight
                pl.BlockSpec((bk, bn), lambda i, j, k: (k, j)),
                # replicate: module bias tile
                pl.BlockSpec((1, bn), lambda i, j, k: (0, j)),
            ],
            # gather: chunk i's output lands at rows [i*bm, (i+1)*bm)
            out_specs=pl.BlockSpec((bm, bn), lambda i, j, k: (i, j)),
            scratch_shapes=[pltpu.VMEM((bm, bn), jnp.float32)],
        ),
        compiler_params=pltpu.CompilerParams(
            # M/N tiles are independent "replica" work -> parallel (maps to the
            # two TensorCores on v7x); K is the reduction -> arbitrary, last.
            dimension_semantics=("parallel", "parallel", "arbitrary"),
        ),
    )(x, w, b)

    if (n_pad, o_pad) != (n, f_out):
        out = out[:n, :f_out]
    return out


if __name__ == "__main__":
    key = jax.random.PRNGKey(0)
    kx, kw, kb = jax.random.split(key, 3)

    # MXU/vreg-friendly shapes: batch 512 scattered into 256-row dim-0 chunks
    # (the DataParallel scatter/gather), hidden 256 -> 256 (lane-dense output).
    N, F_IN, F_OUT = 512, 256, 256

    x = jax.random.normal(kx, (N, F_IN), dtype=jnp.float32)
    # deterministic "module" parameters (synthetic; no checkpoint load)
    w = jax.random.normal(kw, (F_IN, F_OUT), dtype=jnp.float32) * 0.05
    b = jax.random.normal(kb, (1, F_OUT), dtype=jnp.float32) * 0.01

    out = data_parallel_forward(x, w, b)
    out = jax.block_until_ready(out)

    # Reference: DataParallel forward == module(x) on the full batch.
    # Matmul operands are cast to bf16 in-kernel, so compare against a
    # bf16-operand / f32-accumulate reference (tight) and the pure-f32
    # reference (bf16-level tolerance).
    ref_bf16 = jnp.tanh(
        jnp.dot(x.astype(jnp.bfloat16), w.astype(jnp.bfloat16),
                preferred_element_type=jnp.float32) + b)
    ref_f32 = jnp.tanh(x @ w + b)
    assert out.shape == (N, F_OUT)
    assert jnp.allclose(out, ref_bf16, atol=2e-3, rtol=2e-3)
    assert jnp.allclose(out, ref_f32, atol=5e-2, rtol=5e-2)

    # TODO(synk): cross-device RDMA replicate/gather (make_async_remote_copy)
    # is not needed on a single TPU core; the parallel M grid axis stands in
    # for the device replicas (and maps onto v7x's two TensorCores).
    print("KERNEL_OK")
</pallas_src>

<mosaic_0001>
module attributes {stable_mosaic.version = 11 : i64} {
  func.func @_dp_module_kernel(%arg0: i32, %arg1: i32, %arg2: i32, %arg3: memref<256x256xf32, #tpu.memory_space<vmem>>, %arg4: memref<256x256xf32, #tpu.memory_space<vmem>>, %arg5: memref<1x256xf32, #tpu.memory_space<vmem>>, %arg6: memref<256x256xf32, #tpu.memory_space<vmem>>, %arg7: memref<256x256xf32, #tpu.memory_space<vmem>>) attributes {dimension_semantics = [#tpu.dimension_semantics<parallel>, #tpu.dimension_semantics<parallel>, #tpu.dimension_semantics<arbitrary>], iteration_bounds = array<i64: 2, 1, 1>, scalar_prefetch = 0 : i64, scratch_operands = 1 : i64, tpu.core_type = #tpu.core_type<tc>, window_params = [{transform_indices = @transform_0, window_bounds = array<i64: 256, 256>}, {transform_indices = @transform_1, window_bounds = array<i64: 256, 256>}, {transform_indices = @transform_2, window_bounds = array<i64: 1, 256>}, {transform_indices = @transform_3, window_bounds = array<i64: 256, 256>}]} {
    %c0_i32 = arith.constant 0 : i32
    %0 = arith.cmpi eq, %arg2, %c0_i32 : i32
    %1 = arith.extui %0 : i1 to i32
    %c0_i32_0 = arith.constant 0 : i32
    %2 = arith.cmpi ne, %1, %c0_i32_0 : i32
    scf.if %2 {
      %cst_10 = arith.constant 0.000000e+00 : f32
      %14 = vector.broadcast %cst_10 : f32 to vector<256x256xf32>
      %c0_11 = arith.constant 0 : index
      %c0_12 = arith.constant 0 : index
      %15 = vector.load %arg7[%c0_11, %c0_12] : memref<256x256xf32, #tpu.memory_space<vmem>>, vector<256x256xf32>
      tpu.vector_store %arg7[%c0_11, %c0_12], %14 {strides = array<i32>} : memref<256x256xf32, #tpu.memory_space<vmem>>, vector<256x256xf32>,
    } else {
    }
    %c0 = arith.constant 0 : index
    %c0_1 = arith.constant 0 : index
    %3 = vector.load %arg3[%c0, %c0_1] : memref<256x256xf32, #tpu.memory_space<vmem>>, vector<256x256xf32>
    %c0_2 = arith.constant 0 : index
    %c0_3 = arith.constant 0 : index
    %4 = vector.load %arg4[%c0_2, %c0_3] : memref<256x256xf32, #tpu.memory_space<vmem>>, vector<256x256xf32>
    %5 = arith.truncf %3 : vector<256x256xf32> to vector<256x256xbf16>
    %6 = arith.truncf %4 : vector<256x256xf32> to vector<256x256xbf16>
    %c0_4 = arith.constant 0 : index
    %c0_5 = arith.constant 0 : index
    %7 = vector.load %arg7[%c0_4, %c0_5] : memref<256x256xf32, #tpu.memory_space<vmem>>, vector<256x256xf32>
    %cst = arith.constant dense<0.000000e+00> : vector<256x256xf32>
    %8 = tpu.matmul %5, %6, %cst {dimension_numbers = #tpu.dot_dimension_numbers<[1], [0], [0], [1], [0, 0, 1, 1], [], []>} : vector<256x256xbf16>, vector<256x256xbf16>, vector<256x256xf32> -> vector<256x256xf32>
    %9 = arith.addf %7, %8 : vector<256x256xf32>
    %c0_6 = arith.constant 0 : index
    %c0_7 = arith.constant 0 : index
    %10 = vector.load %arg7[%c0_6, %c0_7] : memref<256x256xf32, #tpu.memory_space<vmem>>, vector<256x256xf32>
    tpu.vector_store %arg7[%c0_6, %c0_7], %9 {strides = array<i32>} : memref<256x256xf32, #tpu.memory_space<vmem>>, vector<256x256xf32>,
    %c0_i32_8 = arith.constant 0 : i32
    %11 = arith.cmpi eq, %arg2, %c0_i32_8 : i32
    %12 = arith.extui %11 : i1 to i32
    %c0_i32_9 = arith.constant 0 : i32
    %13 = arith.cmpi ne, %12, %c0_i32_9 : i32
    scf.if %13 {
      %c0_10 = arith.constant 0 : index
      %c0_11 = arith.constant 0 : index
      %14 = vector.load %arg7[%c0_10, %c0_11] : memref<256x256xf32, #tpu.memory_space<vmem>>, vector<256x256xf32>
      %c0_12 = arith.constant 0 : index
      %c0_13 = arith.constant 0 : index
      %15 = vector.load %arg5[%c0_12, %c0_13] : memref<1x256xf32, #tpu.memory_space<vmem>>, vector<1x256xf32>
      %16 = vector.broadcast %15 : vector<1x256xf32> to vector<256x256xf32>
      %17 = arith.addf %14, %16 : vector<256x256xf32>
      %18 = math.tanh %17 : vector<256x256xf32>
      %c0_14 = arith.constant 0 : index
      %c0_15 = arith.constant 0 : index
      %19 = vector.load %arg6[%c0_14, %c0_15] : memref<256x256xf32, #tpu.memory_space<vmem>>, vector<256x256xf32>
      tpu.vector_store %arg6[%c0_14, %c0_15], %18 {strides = array<i32>} : memref<256x256xf32, #tpu.memory_space<vmem>>, vector<256x256xf32>,
    } else {
    }
    return
  }
  func.func @transform_0(%arg0: i32, %arg1: i32, %arg2: i32) -> (i32, i32) {
    %c0_i32 = arith.constant 0 : i32
    return %arg0, %arg2 : i32, i32
  }
  func.func @transform_1(%arg0: i32, %arg1: i32, %arg2: i32) -> (i32, i32) {
    %c0_i32 = arith.constant 0 : i32
    return %arg2, %arg1 : i32, i32
  }
  func.func @transform_2(%arg0: i32, %arg1: i32, %arg2: i32) -> (i32, i32) {
    %c0_i32 = arith.constant 0 : i32
    %c0_i32_0 = arith.constant 0 : i32
    return %c0_i32, %arg1 : i32, i32
  }
  func.func @transform_3(%arg0: i32, %arg1: i32, %arg2: i32) -> (i32, i32) {
    %c0_i32 = arith.constant 0 : i32
    return %arg0, %arg1 : i32, i32
  }
}

</mosaic_0001>

<bundles_post_ra>
// kernel: tpu_custom_call.1
= control target key start
LH: loop header
LB: loop body
LE: loop exit
PB: predicated region body
PF: predicated region fallthrough
CT: control target
= control target key end

     0   :  { %8 = vsyncpa [#allocation4], 0  ;;  %s2141_s0 = inlined_call_operand.hbm [shape: f32[512,256], index: 0, kind: input, shape index: {}]   ;;  %s2142_s1 = inlined_call_operand.hbm [shape: f32[256,256], index: 1, kind: input, shape index: {}]   ;;  %s2143_s2 = inlined_call_operand.vmem [shape: f32[1,256], index: 2, kind: input, shape index: {}]   ;;  %s2144_s3 = inlined_call_operand.hbm [shape: f32[512,256], index: 3, kind: output, shape index: {}]  }
   0x1   :  { %10 = vsyncpa [#allocation4 + $0x1], 0 }
   0x2   :  { %11 = vsyncpa [#allocation7], 0 }
   0x3   :  { %12 = vsyncpa [#allocation5], 0 }
   0x4   :  { %14 = vsyncpa [#allocation5 + $0x1], 0  ;;  %s1746_s12 = smov 0   ;;  %s1748_s13 = smov 0  }
   0x5   :  { %s1750_s14 = smov 0   ;;  %s1752_s15 = smov 0  }
   0x6   :  { %s1754_s16 = smov 0   ;;  %s1756_s17 = smov 0  }
   0x7 LB: > { %s1318_s18 = sadd.s32 4294967295, %s1717_s17   ;;  %s1319_s19 = sadd.s32 4294967294, %s1717_s17   ;;  %s1717_s17 = sphi %s1756_s17, %s20_s17   ;;  %s1713_s16 = sphi %s1754_s16, %s2166_s16   ;;  %s1709_s15 = sphi %s1752_s15, %s2165_s15   ;;  %s1705_s14 = sphi %s1750_s14, %s2164_s14   ;;  %s1701_s13 = sphi %s1748_s13, %s2163_s13   ;;  %s1697_s12 = sphi %s1746_s12, %s2162_s12  }
   0x8   : > { %p61_p0 = scmp.ne.s32.totalorder %s1701_s13, %s1697_s12  ;;  %p1780_p1 = scmp.eq.s32.totalorder %s1318_s18, 0 }
   0x9   : > { %p1784_p2 = scmp.eq.s32.totalorder %s1318_s18, 1  ;;  %p147_p3 = scmp.eq.s32.totalorder %s1319_s19, 1 }
   0xa   : > { %p1790_p4 = por %p1780_p1, %p61_p0  ;;  %p1320_p5 = scmp.ge.s32.totalorder %s1717_s17, 1 }
   0xb   : > { %p1795_p6 = por %p147_p3, %p61_p0  ;;  %p154_p7 = scmp.lt.s32.totalorder %s1717_s17, 3 }
   0xc   : > { %s2150_s22 = scalar_select %p1790_p4, 1, 0 }
   0xd   : > { %s2151_s23 = scalar_select %p1795_p6, 1, 0 }
   0xe   : > { %p1800_p8 = pnand %p1320_p5, %p154_p7  ;;  %s1719_s25 = smov [#allocation6]  }
   0xf   : > { %s172_s26 = sshll.u32 %s1719_s25, 4  ;;  %s39_s28 = sadd.s32 1, %s1713_s16  ;;  %s173_s26 = int_to_ptr.vmem [resolvable:$true] %s172_s26 }
  0x10   : > { %p1382_p9 = pneg %p1800_p8  ;;  %s1590_s29 = scalar_lea.vmem %s173_s26, 8192 }
  0x11   : > { %p1591_p13 = scmp.ne.s32.totalorder %s173_s26, %s1590_s29  ;;  %p1598_p5 = scmp.lt.s32.totalorder %s173_s26, %s173_s26 }
  0x12   : > { %p1809_p11 = pnand %p1382_p9, %p1780_p1  ;;  %p1599_p7 = scmp.lt.s32.totalorder %s1590_s29, %s1590_s29 }
  0x14   : > { %p1581_p12 = pneg %p1809_p11  ;;  %p1600_p6 = por %p1599_p7, %p1598_p5 }
  0x16   : > { %p1593_p0 = pnand %p1591_p13, %p1581_p12 }
  0x18   : > { %p1594_p3 = pneg %p1593_p0 }
  0x1a   : > { %p1601_p4 = pnand %p1600_p6, %p1594_p3 }
  0x1c   : > { %1604 = shalt.err (!%p1601_p4)
}
  0x1d   : > { %s2146_s30 = smov 256   ;;  %s2147_s4 = smov 16  }
  0x1e   : > { %1385 = dma.hbm_to_vmem [thread:$0]  (!%p1809_p11), %s2142_s1, 8192, %s173_s26, [#allocation7], %s2146_s30, %s2146_s30, %s2147_s4  }
  0x1f   : > { %p41_p4 = scmp.ge.s32.totalorder %s39_s28, 2  ;;  %s48_s7 = sadd.s32 1, %s1705_s14 }
  0x20   : > { %p55_p6 = scmp.ne.s32.totalorder %s1705_s14, %s1701_s13  ;;  %p56_p9 = scmp.eq.s32.totalorder %s1717_s17, 0 }
  0x21   : > { %s2168_s28 = smov (%p41_p4, %s39_s28), 0  ;;  %p1395_p0 = scmp.lt.s32.totalorder %s1717_s17, 2 }
  0x22   : > { %p1830_p12 = por %p56_p9, %p55_p6  ;;  %p1836_p13 = por %p1784_p2, %p55_p6 }
  0x23   : > { %s43_s10 = ssub.s32 %s1713_s16, %s2168_s28  ;;  %s194_s11 = sand.u32 1, %s1705_s14  }
  0x24   : > { %p46_p11 = scmp.eq.s32.totalorder %s43_s10, 0  ;;  %s1324_s18 = sshll.u32 %s194_s11, 9 }
  0x25   : > { %s1339_s25 = sshll.u32 %s1713_s16, 13  ;;  %s198_s5 = scalar_lea.vmem [#allocation3], %s1324_s18 }
  0x26   : > { %s1845_s19 = scalar_select %p46_p11, %s1705_s14, %s48_s7  }
  0x27   : > { %s207_s29 = scalar_lea.hbm %s2141_s0, %s1339_s25  ;;  %s208_s6 = sshll.u32 %s198_s5, 4  ;;  %s209_s6 = int_to_ptr.vmem [resolvable:$true] %s208_s6 }
  0x28   : > { %p1853_p2 = pnand %p1395_p0, %p1830_p12  ;;  %s195_s30 = scalar_lea.sflag [#allocation4], %s194_s11 }
  0x29   : > { %s1618_s10 = scalar_lea.vmem %s209_s6, 8192  ;;  %s1722_s7 = smov [#allocation3]  }
  0x2a   : > { %p1607_p3 = pneg %p1853_p2  ;;  %p1619_p5 = scmp.ne.s32.totalorder %s209_s6, %s1618_s10 }
  0x2b   : > { %s1623_s4 = sshll.u32 %s1722_s7, 4  ;;  %s1624_s4 = int_to_ptr.vmem [resolvable:$false] %s1623_s4 }
  0x2c   : > { %p1621_p7 = pnand %p1619_p5, %p1607_p3  ;;  %s1625_s25 = scalar_lea.vmem %s1624_s4, 16384 }
  0x2d   : > { %p1626_p6 = scmp.lt.s32.totalorder %s209_s6, %s1624_s4  ;;  %p1627_p9 = scmp.lt.s32.totalorder %s1625_s25, %s1618_s10 }
  0x2e   : > { %p1622_p4 = pneg %p1621_p7 }
  0x2f   : > { %p1628_p11 = por %p1627_p9, %p1626_p6 }
  0x31   : > { %p1629_p10 = pnand %p1628_p11, %p1622_p4 }
  0x33   : > { %1632 = shalt.err (!%p1629_p10)
}
  0x34   : > { %s2157_s8 = smov 16   ;;  %s2158_s18 = smov 256  }
  0x35   : > { %1389 = dma.hbm_to_vmem [thread:$0]  (!%p1853_p2), %s207_s29, 8192, %s209_s6, %s195_s30, %s2158_s18, %s2158_s18, %s2157_s8  }
  0x36   : > { %220 = sbr.rel (%p1800_p8) target bundleno = 415 (0x19f), region = 32  ;;  %s1867_s11 = sand.u32 (!%p1800_p8), 1, %s1701_s13  }
  0x37   : > { %s1329_s4 = sshll.u32 (!%p1800_p8), %s1867_s11, 9  ;;  %s223_s26 = scalar_lea.sflag (!%p1800_p8), [#allocation4], %s1867_s11 }
  0x38   : > { %s1873_s27 = scalar_lea.vmem (!%p1800_p8), [#allocation3], %s1329_s4  ;;  %p2159_p10 = scmp.ne.s32.totalorder (!%p1800_p8), %s2150_s22, 0 }
  0x3b   : > { %1684 = dma.done.wait (%p2159_p10), %s223_s26, 8192  }
  0x3c   : > { %1686 = vsyncadd (%p2159_p10), %s223_s26, 4294959104 }
  0x3d   : > { %1688 = dma.done.wait (%p1780_p1), [#allocation7], 8192  }
  0x3e   : > { %1690 = vsyncadd (%p1780_p1), [#allocation7], 4294959104  ;;  %v429_v0 = vld [vmem:[#allocation6 + $0xe8] sm:$0xff]  ;;  %v431_v1 = vld [vmem:[#allocation6 + $0xf8] sm:$0xff]  ;;  %s1972_s24 = scalar_lea.vmem [#allocation8], %s1329_s4  ;;  %s1341_s30 = sshll.u32 %s1709_s15, 13 }
  0x3f   : > { %v428_v2 = vld [vmem:[#allocation6 + $0xe0] sm:$0xff]  ;;  %v511_v3 = vpack.c.bf16 %v431_v1, %v429_v0  ;;  %v430_v4 = vld [vmem:[#allocation6 + $0xf0] sm:$0xff]  ;;  %v425_v5 = vld [vmem:[#allocation6 + $0xc8] sm:$0xff]  ;;  %s1201_s29 = sshll.u32 %s1972_s24, 4  ;;  %s2088_s21 = scalar_lea.hbm %s2144_s3, %s1341_s30  ;;  %s2090_s29 = int_to_ptr.vmem [resolvable:$true] %s1201_s29 }
  0x40   : > { %v427_v6 = vld [vmem:[#allocation6 + $0xd8] sm:$0xff]  ;;  %v510_v7 = vpack.c.bf16 %v430_v4, %v428_v2  ;;  %v424_v9 = vld [vmem:[#allocation6 + $0xc0] sm:$0xff]  ;;  %v426_v10 = vld [vmem:[#allocation6 + $0xd0] sm:$0xff]  ;;  %s1185_s15 = scalar_lea.sflag [#allocation5], %s1867_s11  ;;  %s1633_s10 = scalar_lea.vmem %s2090_s29, 8192 }
  0x41   : > { %v509_v8 = vpack.c.bf16 %v427_v6, %v425_v5  ;;  %v421_v11 = vld [vmem:[#allocation6 + $0xa8] sm:$0xff]  ;;  %592 = vmatprep.subr.bf16.mxu0 %v511_v3  ;;  %1342 = vmatprep.subr.bf16.mxu1 %v511_v3  ;;  %v423_v12 = vld [vmem:[#allocation6 + $0xb8] sm:$0xff]  ;;  %v508_v13 = vpack.c.bf16 %v426_v10, %v424_v9  ;;  %v420_v15 = vld [vmem:[#allocation6 + $0xa0] sm:$0xff]  ;;  %p1634_p1 = scmp.ne.s32.totalorder %s2090_s29, %s1633_s10  ;;  %s1723_s7 = smov [#allocation8]  }
  0x42   : > { %593 = vmatpush1.bf16.msra.mxu0 %v510_v7  ;;  %1358 = vmatpush1.bf16.msra.mxu1 %v510_v7  ;;  %v507_v14 = vpack.c.bf16 %v423_v12, %v421_v11  ;;  %v422_v16 = vld [vmem:[#allocation6 + $0xb0] sm:$0xff]  ;;  %v417_v17 = vld [vmem:[#allocation6 + $0x88] sm:$0xff]  ;;  %v419_v18 = vld [vmem:[#allocation6 + $0x98] sm:$0xff]  ;;  %s1637_s25 = sshll.u32 %s1723_s7, 4  ;;  %s1638_s25 = int_to_ptr.vmem [resolvable:$false] %s1637_s25 }
  0x43   : > { %594 = vmatprep.subr.bf16.mxu0 %v509_v8  ;;  %1343 = vmatprep.subr.bf16.mxu1 %v509_v8  ;;  %v506_v19 = vpack.c.bf16 %v422_v16, %v420_v15  ;;  %v505_v20 = vpack.c.bf16 %v419_v18, %v417_v17  ;;  %v416_v21 = vld [vmem:[#allocation6 + $0x80] sm:$0xff]  ;;  %v418_v22 = vld [vmem:[#allocation6 + $0x90] sm:$0xff]  ;;  %v413_v23 = vld [vmem:[#allocation6 + $0x68] sm:$0xff]  ;;  %p1635_p8 = pnand %p1634_p1, %p1836_p13  ;;  %s1639_s8 = scalar_lea.vmem %s1638_s25, 16384 }
  0x44   : > { %v415_v24 = vld [vmem:[#allocation6 + $0x78] sm:$0xff]  ;;  %v504_v25 = vpack.c.bf16 %v418_v22, %v416_v21  ;;  %v412_v27 = vld [vmem:[#allocation6 + $0x60] sm:$0xff]  ;;  %v414_v28 = vld [vmem:[#allocation6 + $0x70] sm:$0xff]  ;;  %p1640_p0 = scmp.lt.s32.totalorder %s2090_s29, %s1638_s25  ;;  %p1641_p2 = scmp.lt.s32.totalorder %s1639_s8, %s1633_s10 }
  0x45   : > { %v503_v26 = vpack.c.bf16 %v415_v24, %v413_v23  ;;  %v409_v29 = vld [vmem:[#allocation6 + $0x48] sm:$0xff]  ;;  %v411_v30 = vld [vmem:[#allocation6 + $0x58] sm:$0xff]  ;;  %v502_v31 = vpack.c.bf16 %v414_v28, %v412_v27  ;;  %v408_v33 = vld [vmem:[#allocation6 + $0x40] sm:$0xff]  ;;  %p1636_p12 = pneg %p1635_p8 }
  0x46   : > { %595 = vmatpush1.bf16.msra.mxu0 %v508_v13  ;;  %1359 = vmatpush1.bf16.msra.mxu1 %v508_v13  ;;  %v501_v32 = vpack.c.bf16 %v411_v30, %v409_v29  ;;  %v410_v34 = vld [vmem:[#allocation6 + $0x50] sm:$0xff]  ;;  %v405_v35 = vld [vmem:[#allocation6 + $0x28] sm:$0xff]  ;;  %v407_v36 = vld [vmem:[#allocation6 + $0x38] sm:$0xff]  ;;  %p1642_p3 = por %p1641_p2, %p1640_p0 }
  0x47   : > { %596 = vmatprep.subr.bf16.mxu0 %v507_v14  ;;  %1344 = vmatprep.subr.bf16.mxu1 %v507_v14  ;;  %v500_v37 = vpack.c.bf16 %v410_v34, %v408_v33  ;;  %v404_v38 = vld [vmem:[#allocation6 + $0x20] sm:$0xff]  ;;  %v406_v39 = vld [vmem:[#allocation6 + $0x30] sm:$0xff]  ;;  %v499_v40 = vpack.c.bf16 %v407_v36, %v405_v35  ;;  %v401_v41 = vld [vmem:[#allocation6 + $0x8] sm:$0xff] }
  0x48   : > { %v337_v42 = vld [vmem:[%s1873_s27 + $0x8] sm:$0xff]  ;;  %v339_v43 = vld [vmem:[%s1873_s27 + $0x18] sm:$0xff]  ;;  %v498_v49 = vpack.c.bf16 %v406_v39, %v404_v38  ;;  %v400_v51 = vld [vmem:[#allocation6] sm:$0xff]  ;;  %p1643_p5 = pnand %p1642_p3, %p1636_p12 }
  0x49   : > { %v403_v44 = vld [vmem:[#allocation6 + $0x18] sm:$0xff]  ;;  %v465_v45 = vpack.c.bf16 %v339_v43, %v337_v42  ;;  %v369_v46 = vld [vmem:[%s1873_s27 + $0x108] sm:$0xff]  ;;  %v402_v52 = vld [vmem:[#allocation6 + $0x10] sm:$0xff] }
  0x4a   : > { %597 = vmatpush1.bf16.msra.mxu0 %v506_v19  ;;  %1360 = vmatpush1.bf16.msra.mxu1 %v506_v19  ;;  %v371_v47 = vld [vmem:[%s1873_s27 + $0x118] sm:$0xff]  ;;  %v497_v50 = vpack.c.bf16 %v403_v44, %v401_v41  ;;  %v461_v53 = vld [vmem:[#allocation6 + $0x1e8] sm:$0xff]  ;;  %v496_v55 = vpack.c.bf16 %v402_v52, %v400_v51  ;;  %v460_v57 = vld [vmem:[#allocation6 + $0x1e0] sm:$0xff] }
  0x4b   : > { %598 = vmatprep.subr.bf16.mxu0 %v505_v20  ;;  %1345 = vmatprep.subr.bf16.mxu1 %v505_v20  ;;  %v481_v48 = vpack.c.bf16 %v371_v47, %v369_v46  ;;  %v463_v54 = vld [vmem:[#allocation6 + $0x1f8] sm:$0xff]  ;;  %v462_v58 = vld [vmem:[#allocation6 + $0x1f0] sm:$0xff]  ;;  %v457_v59 = vld [vmem:[#allocation6 + $0x1c8] sm:$0xff] }
  0x4c   : > { %624 = vmatprep.mubr.bf16.mxu0 %v465_v45  ;;  %v527_v56 = vpack.c.bf16 %v463_v54, %v461_v53  ;;  %v459_v60 = vld [vmem:[#allocation6 + $0x1d8] sm:$0xff]  ;;  %v526_v61 = vpack.c.bf16 %v462_v58, %v460_v57  ;;  %v456_v63 = vld [vmem:[#allocation6 + $0x1c0] sm:$0xff]  ;;  %v458_v0 = vld [vmem:[#allocation6 + $0x1d0] sm:$0xff] }
  0x4d   : > { %704 = vmatprep.mubr.bf16.mxu1 %v481_v48  ;;  %v525_v62 = vpack.c.bf16 %v459_v60, %v457_v59  ;;  %v453_v1 = vld [vmem:[#allocation6 + $0x1a8] sm:$0xff]  ;;  %v455_v2 = vld [vmem:[#allocation6 + $0x1b8] sm:$0xff]  ;;  %v524_v3 = vpack.c.bf16 %v458_v0, %v456_v63  ;;  %v452_v5 = vld [vmem:[#allocation6 + $0x1a0] sm:$0xff] }
  0x4e   : > { %599 = vmatpush1.bf16.msra.mxu0 %v504_v25  ;;  %1361 = vmatpush1.bf16.msra.mxu1 %v504_v25  ;;  %v523_v4 = vpack.c.bf16 %v455_v2, %v453_v1  ;;  %v454_v6 = vld [vmem:[#allocation6 + $0x1b0] sm:$0xff]  ;;  %v449_v7 = vld [vmem:[#allocation6 + $0x188] sm:$0xff]  ;;  %v451_v8 = vld [vmem:[#allocation6 + $0x198] sm:$0xff] }
  0x4f   : > { %600 = vmatprep.subr.bf16.mxu0 %v503_v26  ;;  %1346 = vmatprep.subr.bf16.mxu1 %v503_v26  ;;  %v522_v9 = vpack.c.bf16 %v454_v6, %v452_v5  ;;  %v521_v10 = vpack.c.bf16 %v451_v8, %v449_v7  ;;  %v448_v11 = vld [vmem:[#allocation6 + $0x180] sm:$0xff]  ;;  %v450_v12 = vld [vmem:[#allocation6 + $0x190] sm:$0xff]  ;;  %v445_v13 = vld [vmem:[#allocation6 + $0x168] sm:$0xff] }
  0x50   : > { %v447_v14 = vld [vmem:[#allocation6 + $0x178] sm:$0xff]  ;;  %v520_v15 = vpack.c.bf16 %v450_v12, %v448_v11  ;;  %v444_v17 = vld [vmem:[#allocation6 + $0x160] sm:$0xff]  ;;  %v446_v18 = vld [vmem:[#allocation6 + $0x170] sm:$0xff] }
  0x51   : > { %v519_v16 = vpack.c.bf16 %v447_v14, %v445_v13  ;;  %v441_v19 = vld [vmem:[#allocation6 + $0x148] sm:$0xff]  ;;  %v443_v20 = vld [vmem:[#allocation6 + $0x158] sm:$0xff]  ;;  %v518_v21 = vpack.c.bf16 %v446_v18, %v444_v17  ;;  %v440_v23 = vld [vmem:[#allocation6 + $0x140] sm:$0xff] }
  0x52   : > { %601 = vmatpush1.bf16.msra.mxu0 %v502_v31  ;;  %1362 = vmatpush1.bf16.msra.mxu1 %v502_v31  ;;  %v517_v22 = vpack.c.bf16 %v443_v20, %v441_v19  ;;  %v442_v24 = vld [vmem:[#allocation6 + $0x150] sm:$0xff]  ;;  %v437_v25 = vld [vmem:[#allocation6 + $0x128] sm:$0xff]  ;;  %v439_v26 = vld [vmem:[#allocation6 + $0x138] sm:$0xff] }
  0x53   : > { %602 = vmatprep.subr.bf16.mxu0 %v501_v32  ;;  %1347 = vmatprep.subr.bf16.mxu1 %v501_v32  ;;  %v516_v27 = vpack.c.bf16 %v442_v24, %v440_v23  ;;  %v515_v28 = vpack.c.bf16 %v439_v26, %v437_v25  ;;  %v436_v29 = vld [vmem:[#allocation6 + $0x120] sm:$0xff]  ;;  %v438_v30 = vld [vmem:[#allocation6 + $0x130] sm:$0xff]  ;;  %v433_v31 = vld [vmem:[#allocation6 + $0x108] sm:$0xff] }
  0x54   : > { %v435_v32 = vld [vmem:[#allocation6 + $0x118] sm:$0xff]  ;;  %v514_v33 = vpack.c.bf16 %v438_v30, %v436_v29  ;;  %v432_v35 = vld [vmem:[#allocation6 + $0x100] sm:$0xff]  ;;  %v434_v36 = vld [vmem:[#allocation6 + $0x110] sm:$0xff] }
  0x55   : > { %v513_v34 = vpack.c.bf16 %v435_v32, %v433_v31  ;;  %v338_v38 = vld [vmem:[%s1873_s27 + $0x10] sm:$0xff]  ;;  %v512_v39 = vpack.c.bf16 %v434_v36, %v432_v35  ;;  %v341_v42 = vld [vmem:[%s1873_s27 + $0x28] sm:$0xff]  ;;  %v343_v43 = vld [vmem:[%s1873_s27 + $0x38] sm:$0xff] }
  0x56   : > { %603 = vmatpush1.bf16.msra.mxu0 %v500_v37  ;;  %1363 = vmatpush1.bf16.msra.mxu1 %v500_v37  ;;  %v336_v37 = vld [vmem:[%s1873_s27] sm:$0xff]  ;;  %v370_v41 = vld [vmem:[%s1873_s27 + $0x110] sm:$0xff]  ;;  %v373_v44 = vld [vmem:[%s1873_s27 + $0x128] sm:$0xff]  ;;  %v467_v48 = vpack.c.bf16 %v343_v43, %v341_v42 }
  0x57   : > { %604 = vmatprep.subr.bf16.mxu0 %v499_v40  ;;  %1348 = vmatprep.subr.bf16.mxu1 %v499_v40  ;;  %v368_v40 = vld [vmem:[%s1873_s27 + $0x100] sm:$0xff]  ;;  %v375_v45 = vld [vmem:[%s1873_s27 + $0x138] sm:$0xff]  ;;  %v464_v46 = vpack.c.bf16 %v338_v38, %v336_v37  ;;  %v342_v51 = vld [vmem:[%s1873_s27 + $0x30] sm:$0xff] }
  0x58   : > { %v480_v47 = vpack.c.bf16 %v370_v41, %v368_v40  ;;  %v372_v52 = vld [vmem:[%s1873_s27 + $0x120] sm:$0xff]  ;;  %v374_v53 = vld [vmem:[%s1873_s27 + $0x130] sm:$0xff]  ;;  %v345_v54 = vld [vmem:[%s1873_s27 + $0x48] sm:$0xff] }
  0x59   : > { %v379_v57 = vld [vmem:[%s1873_s27 + $0x158] sm:$0xff]  ;;  %v482_v59 = vpack.c.bf16 %v374_v53, %v372_v52  ;;  %v346_v63 = vld [vmem:[%s1873_s27 + $0x50] sm:$0xff]  ;;  %v376_v0 = vld [vmem:[%s1873_s27 + $0x140] sm:$0xff] }
  0x5a   : > { %605 = vmatpush1.bf16.msra.mxu0 %v498_v49  ;;  %1364 = vmatpush1.bf16.msra.mxu1 %v498_v49  ;;  %v483_v49 = vpack.c.bf16 %v375_v45, %v373_v44  ;;  %v378_v1 = vld [vmem:[%s1873_s27 + $0x150] sm:$0xff]  ;;  %v349_v2 = vld [vmem:[%s1873_s27 + $0x68] sm:$0xff]  ;;  %v383_v5 = vld [vmem:[%s1873_s27 + $0x178] sm:$0xff] }
  0x5b   : > { %606 = vmatprep.subr.bf16.mxu0 %v497_v50  ;;  %1349 = vmatprep.subr.bf16.mxu1 %v497_v50  ;;  %v340_v50 = vld [vmem:[%s1873_s27 + $0x20] sm:$0xff]  ;;  %v484_v7 = vpack.c.bf16 %v378_v1, %v376_v0  ;;  %v350_v11 = vld [vmem:[%s1873_s27 + $0x70] sm:$0xff]  ;;  %v353_v14 = vld [vmem:[%s1873_s27 + $0x88] sm:$0xff]  ;;  %v982_v0 = vlaneseq }
  0x5c   : > { %v466_v58 = vpack.c.bf16 %v342_v51, %v340_v50  ;;  %v380_v12 = vld [vmem:[%s1873_s27 + $0x160] sm:$0xff]  ;;  %v382_v13 = vld [vmem:[%s1873_s27 + $0x170] sm:$0xff]  ;;  %v387_v17 = vld [vmem:[%s1873_s27 + $0x198] sm:$0xff] }
  0x5d   : > { %v486_v19 = vpack.c.bf16 %v382_v13, %v380_v12  ;;  %v354_v23 = vld [vmem:[%s1873_s27 + $0x90] sm:$0xff]  ;;  %v384_v24 = vld [vmem:[%s1873_s27 + $0x180] sm:$0xff]  ;;  %v357_v26 = vld [vmem:[%s1873_s27 + $0xa8] sm:$0xff]  ;;  %v983_v1 = vshrl.u32 %v982_v0, 7 }
  0x5e   : > { %607 = vmatpush1.bf16.msra.mxu0 %v496_v55  ;;  %1365 = vmatpush1.bf16.msra.mxu1 %v496_v55  ;;  %v347_v55 = vld [vmem:[%s1873_s27 + $0x58] sm:$0xff]  ;;  %v386_v25 = vld [vmem:[%s1873_s27 + $0x190] sm:$0xff]  ;;  %v388_v36 = vld [vmem:[%s1873_s27 + $0x1a0] sm:$0xff] }
  0x5f   : > { %608 = vmatprep.subr.bf16.mxu0 %v527_v56  ;;  %1350 = vmatprep.subr.bf16.mxu1 %v527_v56  ;;  %v377_v56 = vld [vmem:[%s1873_s27 + $0x148] sm:$0xff]  ;;  %v469_v60 = vpack.c.bf16 %v347_v55, %v345_v54  ;;  %v391_v29 = vld [vmem:[%s1873_s27 + $0x1b8] sm:$0xff]  ;;  %v488_v31 = vpack.c.bf16 %v386_v25, %v384_v24  ;;  %v358_v35 = vld [vmem:[%s1873_s27 + $0xb0] sm:$0xff] }
  0x60   : > { %v390_v37 = vld [vmem:[%s1873_s27 + $0x1b0] sm:$0xff]  ;;  %v361_v38 = vld [vmem:[%s1873_s27 + $0xc8] sm:$0xff]  ;;  %v395_v41 = vld [vmem:[%s1873_s27 + $0x1d8] sm:$0xff] }
  0x61   : > { %v393_v40 = vld [vmem:[%s1873_s27 + $0x1c8] sm:$0xff]  ;;  %v490_v43 = vpack.c.bf16 %v390_v37, %v388_v36  ;;  %v367_v51 = vld [vmem:[%s1873_s27 + $0xf8] sm:$0xff] }
  0x62   : > { %609 = vmatpush2.bf16.msra.mxu0 %v526_v61  ;;  %1366 = vmatpush2.bf16.msra.mxu1 %v526_v61  ;;  %v485_v61 = vpack.c.bf16 %v379_v57, %v377_v56  ;;  %v493_v45 = vpack.c.bf16 %v395_v41, %v393_v40  ;;  %v365_v50 = vld [vmem:[%s1873_s27 + $0xe8] sm:$0xff]  ;;  %v399_v53 = vld [vmem:[%s1873_s27 + $0x1f8] sm:$0xff] }
  0x63   : > { %610 = vmatprep.subr.bf16.mxu0 %v525_v62  ;;  %1351 = vmatprep.subr.bf16.mxu1 %v525_v62  ;;  %v344_v62 = vld [vmem:[%s1873_s27 + $0x40] sm:$0xff]  ;;  %v397_v52 = vld [vmem:[%s1873_s27 + $0x1e8] sm:$0xff]  ;;  %v479_v56 = vpack.c.bf16 %v367_v51, %v365_v50 }
  0x64   : > { %v468_v6 = vpack.c.bf16 %v346_v63, %v344_v62  ;;  %v495_v57 = vpack.c.bf16 %v399_v53, %v397_v52 }
  0x66   : > { %611 = vmatpush2.bf16.msra.mxu0 %v524_v3  ;;  %1367 = vmatpush2.bf16.msra.mxu1 %v524_v3  ;;  %v351_v3 = vld [vmem:[%s1873_s27 + $0x78] sm:$0xff] }
  0x67   : > { %612 = vmatprep.subr.bf16.mxu0 %v523_v4  ;;  %1352 = vmatprep.subr.bf16.mxu1 %v523_v4  ;;  %v381_v4 = vld [vmem:[%s1873_s27 + $0x168] sm:$0xff]  ;;  %v471_v8 = vpack.c.bf16 %v351_v3, %v349_v2  ;;  %v984_v2 = vsub.s32 0, %v983_v1  ;;  %v980_v3 = vld [vmem:[%s2143_s2] sm:$0x3] }
  0x6a   : > { %613 = vmatpush2.bf16.msra.mxu0 %v522_v9  ;;  %1368 = vmatpush2.bf16.msra.mxu1 %v522_v9  ;;  %v487_v9 = vpack.c.bf16 %v383_v5, %v381_v4  ;;  %v988_v4 = vsub.s32 1, %v983_v1  ;;  %v1950_v5 = vrot.slane %v980_v3, %v984_v2 }
  0x6b   : > { %614 = vmatprep.subr.bf16.mxu0 %v521_v10  ;;  %1353 = vmatprep.subr.bf16.mxu1 %v521_v10  ;;  %v348_v10 = vld [vmem:[%s1873_s27 + $0x60] sm:$0xff] }
  0x6c   : > { %v470_v18 = vpack.c.bf16 %v350_v11, %v348_v10 }
  0x6e   : > { %615 = vmatpush2.bf16.msra.mxu0 %v520_v15  ;;  %1369 = vmatpush2.bf16.msra.mxu1 %v520_v15  ;;  %v355_v15 = vld [vmem:[%s1873_s27 + $0x98] sm:$0xff] }
  0x6f   : > { %616 = vmatprep.subr.bf16.mxu0 %v519_v16  ;;  %1354 = vmatprep.subr.bf16.mxu1 %v519_v16  ;;  %v385_v16 = vld [vmem:[%s1873_s27 + $0x188] sm:$0xff]  ;;  %v473_v20 = vpack.c.bf16 %v355_v15, %v353_v14 }
  0x72   : > { %617 = vmatpush2.bf16.msra.mxu0 %v518_v21  ;;  %1370 = vmatpush2.bf16.msra.mxu1 %v518_v21  ;;  %v489_v21 = vpack.c.bf16 %v387_v17, %v385_v16 }
  0x73   : > { %618 = vmatprep.subr.bf16.mxu0 %v517_v22  ;;  %1355 = vmatprep.subr.bf16.mxu1 %v517_v22  ;;  %v352_v22 = vld [vmem:[%s1873_s27 + $0x80] sm:$0xff] }
  0x74   : > { %v472_v30 = vpack.c.bf16 %v354_v23, %v352_v22 }
  0x76   : > { %619 = vmatpush2.bf16.msra.mxu0 %v516_v27  ;;  %1371 = vmatpush2.bf16.msra.mxu1 %v516_v27  ;;  %v359_v27 = vld [vmem:[%s1873_s27 + $0xb8] sm:$0xff] }
  0x77   : > { %620 = vmatprep.subr.bf16.mxu0 %v515_v28  ;;  %1356 = vmatprep.subr.bf16.mxu1 %v515_v28  ;;  %v389_v28 = vld [vmem:[%s1873_s27 + $0x1a8] sm:$0xff]  ;;  %v475_v32 = vpack.c.bf16 %v359_v27, %v357_v26 }
  0x7a   : > { %621 = vmatpush2.bf16.msra.mxu0 %v514_v33  ;;  %1372 = vmatpush2.bf16.msra.mxu1 %v514_v33  ;;  %v491_v33 = vpack.c.bf16 %v391_v29, %v389_v28 }
  0x7b   : > { %622 = vmatprep.subr.bf16.mxu0 %v513_v34  ;;  %1357 = vmatprep.subr.bf16.mxu1 %v513_v34  ;;  %v356_v34 = vld [vmem:[%s1873_s27 + $0xa0] sm:$0xff] }
  0x7c   : > { %v474_v42 = vpack.c.bf16 %v358_v35, %v356_v34 }
  0x7e   : > { %623 = vmatpush2.bf16.msra.mxu0 %v512_v39  ;;  %1373 = vmatpush2.bf16.msra.mxu1 %v512_v39  ;;  %v363_v39 = vld [vmem:[%s1873_s27 + $0xd8] sm:$0xff] }
  0x7f   : > { %v477_v44 = vpack.c.bf16 %v363_v39, %v361_v38 }
  0x81   : > { %625 = vmatmul.mubr.bf16.vlgmr.msra.gmra.mxu0 %v464_v46  ;;  %705 = vmatmul.mubr.bf16.vlgmr.msra.gmra.mxu1 %v480_v47  ;;  %v360_v46 = vld [vmem:[%s1873_s27 + $0xc0] sm:$0xff]  ;;  %v362_v47 = vld [vmem:[%s1873_s27 + $0xd0] sm:$0xff] }
  0x82   : > { %634 = vmatprep.mubr.bf16.mxu0 %v467_v48  ;;  %714 = vmatprep.mubr.bf16.mxu1 %v483_v49  ;;  %v392_v48 = vld [vmem:[%s1873_s27 + $0x1c0] sm:$0xff]  ;;  %v394_v49 = vld [vmem:[%s1873_s27 + $0x1d0] sm:$0xff]  ;;  %v476_v54 = vpack.c.bf16 %v362_v47, %v360_v46 }
  0x83   : > { %v492_v55 = vpack.c.bf16 %v394_v49, %v392_v48 }
  0x89   : > { %635 = vmatmul.mubr.bf16.gmra.mxu0 %v466_v58  ;;  %715 = vmatmul.mubr.bf16.gmra.mxu1 %v482_v59  ;;  %v364_v58 = vld [vmem:[%s1873_s27 + $0xe0] sm:$0xff]  ;;  %v366_v59 = vld [vmem:[%s1873_s27 + $0xf0] sm:$0xff] }
  0x8a   : > { %644 = vmatprep.mubr.bf16.mxu0 %v469_v60  ;;  %724 = vmatprep.mubr.bf16.mxu1 %v485_v61  ;;  %v396_v60 = vld [vmem:[%s1873_s27 + $0x1e0] sm:$0xff]  ;;  %v398_v61 = vld [vmem:[%s1873_s27 + $0x1f0] sm:$0xff]  ;;  %v478_v62 = vpack.c.bf16 %v366_v59, %v364_v58 }
  0x8b   : > { %v494_v63 = vpack.c.bf16 %v398_v61, %v396_v60 }
  0x91   : > { %645 = vmatmul.mubr.bf16.gmra.mxu0 %v468_v6  ;;  %725 = vmatmul.mubr.bf16.gmra.mxu1 %v484_v7  ;;  %v1952_v6 = vrot.slane %v980_v3, %v988_v4 }
  0x92   : > { %654 = vmatprep.mubr.bf16.mxu0 %v471_v8  ;;  %734 = vmatprep.mubr.bf16.mxu1 %v487_v9 }
  0x99   : > { %655 = vmatmul.mubr.bf16.gmra.mxu0 %v470_v18  ;;  %735 = vmatmul.mubr.bf16.gmra.mxu1 %v486_v19 }
  0x9a   : > { %664 = vmatprep.mubr.bf16.mxu0 %v473_v20  ;;  %744 = vmatprep.mubr.bf16.mxu1 %v489_v21 }
  0xa1   : > { %665 = vmatmul.mubr.bf16.gmra.mxu0 %v472_v30  ;;  %745 = vmatmul.mubr.bf16.gmra.mxu1 %v488_v31 }
  0xa2   : > { %674 = vmatprep.mubr.bf16.mxu0 %v475_v32  ;;  %754 = vmatprep.mubr.bf16.mxu1 %v491_v33 }
  0xa9   : > { %675 = vmatmul.mubr.bf16.gmra.mxu0 %v474_v42  ;;  %755 = vmatmul.mubr.bf16.gmra.mxu1 %v490_v43 }
  0xaa   : > { %684 = vmatprep.mubr.bf16.mxu0 %v477_v44  ;;  %764 = vmatprep.mubr.bf16.mxu1 %v493_v45 }
  0xb1   : > { %685 = vmatmul.mubr.bf16.gmra.mxu0 %v476_v54  ;;  %765 = vmatmul.mubr.bf16.gmra.mxu1 %v492_v55 }
  0xb2   : > { %694 = vmatprep.mubr.bf16.mxu0 %v479_v56  ;;  %774 = vmatprep.mubr.bf16.mxu1 %v495_v57 }
  0xb9   : > { %695 = vmatmul.mubr.bf16.gmra.mxu0 %v478_v62  ;;  %775 = vmatmul.mubr.bf16.gmra.mxu1 %v494_v63 }
 0x141   : > { %v626_v7 = vpop.f32.mrf.mxu0  ;;  %v706_v8 = vpop.f32.mrf.mxu1 }
 0x142   : > { %v992_v9 = vadd.f32 %v1950_v5, %v626_v7  ;;  %v1024_v10 = vadd.f32 %v1950_v5, %v706_v8 }
 0x143   : > { %v628_v11 = vpop.f32.mrf.mxu0  ;;  %v708_v12 = vpop.f32.mrf.mxu1 }
 0x144   : > { %1451 = vtanh.f32 %v992_v9  ;;  %v993_v13 = vadd.f32 %v1952_v6, %v628_v11  ;;  %v1025_v14 = vadd.f32 %v1952_v6, %v708_v12 }
 0x145   : > { %1453 = vtanh.f32 %v1024_v10  ;;  %v630_v15 = vpop.f32.mrf.mxu0  ;;  %v710_v16 = vpop.f32.mrf.mxu1 }
 0x146   : > { %1455 = vtanh.f32 %v993_v13  ;;  %v994_v17 = vadd.f32 %v1950_v5, %v630_v15  ;;  %v1026_v18 = vadd.f32 %v1950_v5, %v710_v16 }
 0x147   : > { %1457 = vtanh.f32 %v1025_v14  ;;  %v632_v19 = vpop.f32.mrf.mxu0  ;;  %v712_v20 = vpop.f32.mrf.mxu1 }
 0x148   : > { %1459 = vtanh.f32 %v994_v17  ;;  %v995_v21 = vadd.f32 %v1952_v6, %v632_v19  ;;  %v1027_v22 = vadd.f32 %v1952_v6, %v712_v20 }
 0x149   : > { %1461 = vtanh.f32 %v1026_v18  ;;  %v636_v23 = vpop.f32.mrf.mxu0  ;;  %v716_v24 = vpop.f32.mrf.mxu1 }
 0x14a   : > { %1463 = vtanh.f32 %v995_v21  ;;  %v996_v25 = vadd.f32 %v1950_v5, %v636_v23  ;;  %v1028_v26 = vadd.f32 %v1950_v5, %v716_v24 }
 0x14b   : > { %1465 = vtanh.f32 %v1027_v22  ;;  %v638_v27 = vpop.f32.mrf.mxu0  ;;  %v718_v28 = vpop.f32.mrf.mxu1 }
 0x14c   : > { %1467 = vtanh.f32 %v996_v25  ;;  %v997_v29 = vadd.f32 %v1952_v6, %v638_v27  ;;  %v1029_v30 = vadd.f32 %v1952_v6, %v718_v28 }
 0x14d   : > { %1469 = vtanh.f32 %v1028_v26  ;;  %v640_v31 = vpop.f32.mrf.mxu0  ;;  %v720_v32 = vpop.f32.mrf.mxu1 }
 0x14e   : > { %1471 = vtanh.f32 %v997_v29  ;;  %v998_v33 = vadd.f32 %v1950_v5, %v640_v31  ;;  %v1030_v34 = vadd.f32 %v1950_v5, %v720_v32 }
 0x14f   : > { %1473 = vtanh.f32 %v1029_v30  ;;  %v642_v35 = vpop.f32.mrf.mxu0  ;;  %v722_v36 = vpop.f32.mrf.mxu1 }
 0x150   : > { %1475 = vtanh.f32 %v998_v33  ;;  %v999_v37 = vadd.f32 %v1952_v6, %v642_v35  ;;  %v1031_v38 = vadd.f32 %v1952_v6, %v722_v36 }
 0x151   : > { %v1452_v39 = vpop.eup %1451  ;;  %1477 = vtanh.f32 %v1030_v34  ;;  %v646_v40 = vpop.f32.mrf.mxu0 }
 0x152   : > { %v726_v41 = vpop.f32.mrf.mxu1  ;;  %v1454_v42 = vpop.eup %1453  ;;  %1120 = vst [vmem:[%s1972_s24] sm:$0xff] %v1452_v39  ;;  %1479 = vtanh.f32 %v999_v37  ;;  %v1000_v43 = vadd.f32 %v1950_v5, %v646_v40 }
 0x153   : > { %v1032_v44 = vadd.f32 %v1950_v5, %v726_v41  ;;  %v1456_v45 = vpop.eup %1455  ;;  %1152 = vst [vmem:[%s1972_s24 + $0x100] sm:$0xff] %v1454_v42  ;;  %1481 = vtanh.f32 %v1031_v38  ;;  %v648_v46 = vpop.f32.mrf.mxu0 }
 0x154   : > { %v728_v47 = vpop.f32.mrf.mxu1  ;;  %v1458_v48 = vpop.eup %1457  ;;  %1121 = vst [vmem:[%s1972_s24 + $0x8] sm:$0xff] %v1456_v45  ;;  %1483 = vtanh.f32 %v1000_v43  ;;  %v1001_v49 = vadd.f32 %v1952_v6, %v648_v46 }
 0x155   : > { %v1033_v50 = vadd.f32 %v1952_v6, %v728_v47  ;;  %v1460_v51 = vpop.eup %1459  ;;  %1153 = vst [vmem:[%s1972_s24 + $0x108] sm:$0xff] %v1458_v48  ;;  %1485 = vtanh.f32 %v1032_v44  ;;  %v650_v52 = vpop.f32.mrf.mxu0 }
 0x156   : > { %v730_v53 = vpop.f32.mrf.mxu1  ;;  %v1462_v54 = vpop.eup %1461  ;;  %1122 = vst [vmem:[%s1972_s24 + $0x10] sm:$0xff] %v1460_v51  ;;  %1487 = vtanh.f32 %v1001_v49  ;;  %v1002_v55 = vadd.f32 %v1950_v5, %v650_v52 }
 0x157   : > { %v1034_v56 = vadd.f32 %v1950_v5, %v730_v53  ;;  %v1464_v57 = vpop.eup %1463  ;;  %1154 = vst [vmem:[%s1972_s24 + $0x110] sm:$0xff] %v1462_v54  ;;  %1489 = vtanh.f32 %v1033_v50  ;;  %v652_v58 = vpop.f32.mrf.mxu0 }
 0x158   : > { %v732_v59 = vpop.f32.mrf.mxu1  ;;  %v1466_v60 = vpop.eup %1465  ;;  %1123 = vst [vmem:[%s1972_s24 + $0x18] sm:$0xff] %v1464_v57  ;;  %1491 = vtanh.f32 %v1002_v55  ;;  %v1003_v61 = vadd.f32 %v1952_v6, %v652_v58 }
 0x159   : > { %v1035_v62 = vadd.f32 %v1952_v6, %v732_v59  ;;  %v1468_v63 = vpop.eup %1467  ;;  %1155 = vst [vmem:[%s1972_s24 + $0x118] sm:$0xff] %v1466_v60  ;;  %1493 = vtanh.f32 %v1034_v56  ;;  %v656_v0 = vpop.f32.mrf.mxu0 }
 0x15a   : > { %v736_v1 = vpop.f32.mrf.mxu1  ;;  %v1470_v2 = vpop.eup %1469  ;;  %1124 = vst [vmem:[%s1972_s24 + $0x20] sm:$0xff] %v1468_v63  ;;  %1495 = vtanh.f32 %v1003_v61  ;;  %v1004_v3 = vadd.f32 %v1950_v5, %v656_v0 }
 0x15b   : > { %v1036_v4 = vadd.f32 %v1950_v5, %v736_v1  ;;  %v1472_v7 = vpop.eup %1471  ;;  %1156 = vst [vmem:[%s1972_s24 + $0x120] sm:$0xff] %v1470_v2  ;;  %1497 = vtanh.f32 %v1035_v62  ;;  %v658_v8 = vpop.f32.mrf.mxu0 }
 0x15c   : > { %v738_v9 = vpop.f32.mrf.mxu1  ;;  %v1474_v10 = vpop.eup %1473  ;;  %1125 = vst [vmem:[%s1972_s24 + $0x28] sm:$0xff] %v1472_v7  ;;  %1499 = vtanh.f32 %v1004_v3  ;;  %v1005_v11 = vadd.f32 %v1952_v6, %v658_v8 }
 0x15d   : > { %v1037_v12 = vadd.f32 %v1952_v6, %v738_v9  ;;  %v1476_v13 = vpop.eup %1475  ;;  %1157 = vst [vmem:[%s1972_s24 + $0x128] sm:$0xff] %v1474_v10  ;;  %1501 = vtanh.f32 %v1036_v4  ;;  %v660_v14 = vpop.f32.mrf.mxu0 }
 0x15e   : > { %v740_v15 = vpop.f32.mrf.mxu1  ;;  %v1478_v16 = vpop.eup %1477  ;;  %1126 = vst [vmem:[%s1972_s24 + $0x30] sm:$0xff] %v1476_v13  ;;  %1503 = vtanh.f32 %v1005_v11  ;;  %v1006_v17 = vadd.f32 %v1950_v5, %v660_v14 }
 0x15f   : > { %v1038_v18 = vadd.f32 %v1950_v5, %v740_v15  ;;  %v1480_v19 = vpop.eup %1479  ;;  %1158 = vst [vmem:[%s1972_s24 + $0x130] sm:$0xff] %v1478_v16  ;;  %1505 = vtanh.f32 %v1037_v12  ;;  %v662_v20 = vpop.f32.mrf.mxu0 }
 0x160   : > { %v742_v21 = vpop.f32.mrf.mxu1  ;;  %v1482_v22 = vpop.eup %1481  ;;  %1127 = vst [vmem:[%s1972_s24 + $0x38] sm:$0xff] %v1480_v19  ;;  %1507 = vtanh.f32 %v1006_v17  ;;  %v1007_v23 = vadd.f32 %v1952_v6, %v662_v20 }
 0x161   : > { %v1039_v24 = vadd.f32 %v1952_v6, %v742_v21  ;;  %v1484_v25 = vpop.eup %1483  ;;  %1159 = vst [vmem:[%s1972_s24 + $0x138] sm:$0xff] %v1482_v22  ;;  %1509 = vtanh.f32 %v1038_v18  ;;  %v666_v26 = vpop.f32.mrf.mxu0 }
 0x162   : > { %v746_v27 = vpop.f32.mrf.mxu1  ;;  %v1486_v28 = vpop.eup %1485  ;;  %1128 = vst [vmem:[%s1972_s24 + $0x40] sm:$0xff] %v1484_v25  ;;  %1511 = vtanh.f32 %v1007_v23  ;;  %v1008_v29 = vadd.f32 %v1950_v5, %v666_v26 }
 0x163   : > { %v1040_v30 = vadd.f32 %v1950_v5, %v746_v27  ;;  %v1488_v31 = vpop.eup %1487  ;;  %1160 = vst [vmem:[%s1972_s24 + $0x140] sm:$0xff] %v1486_v28  ;;  %1513 = vtanh.f32 %v1039_v24  ;;  %v668_v32 = vpop.f32.mrf.mxu0 }
 0x164   : > { %v748_v33 = vpop.f32.mrf.mxu1  ;;  %v1490_v34 = vpop.eup %1489  ;;  %1129 = vst [vmem:[%s1972_s24 + $0x48] sm:$0xff] %v1488_v31  ;;  %1515 = vtanh.f32 %v1008_v29  ;;  %v1009_v35 = vadd.f32 %v1952_v6, %v668_v32 }
 0x165   : > { %v1041_v36 = vadd.f32 %v1952_v6, %v748_v33  ;;  %v1492_v37 = vpop.eup %1491  ;;  %1161 = vst [vmem:[%s1972_s24 + $0x148] sm:$0xff] %v1490_v34  ;;  %1517 = vtanh.f32 %v1040_v30  ;;  %v670_v38 = vpop.f32.mrf.mxu0 }
 0x166   : > { %v750_v39 = vpop.f32.mrf.mxu1  ;;  %v1494_v40 = vpop.eup %1493  ;;  %1130 = vst [vmem:[%s1972_s24 + $0x50] sm:$0xff] %v1492_v37  ;;  %1519 = vtanh.f32 %v1009_v35  ;;  %v1010_v41 = vadd.f32 %v1950_v5, %v670_v38 }
 0x167   : > { %v1042_v42 = vadd.f32 %v1950_v5, %v750_v39  ;;  %v1496_v43 = vpop.eup %1495  ;;  %1162 = vst [vmem:[%s1972_s24 + $0x150] sm:$0xff] %v1494_v40  ;;  %1521 = vtanh.f32 %v1041_v36  ;;  %v672_v44 = vpop.f32.mrf.mxu0 }
 0x168   : > { %v752_v45 = vpop.f32.mrf.mxu1  ;;  %v1498_v46 = vpop.eup %1497  ;;  %1131 = vst [vmem:[%s1972_s24 + $0x58] sm:$0xff] %v1496_v43  ;;  %1523 = vtanh.f32 %v1010_v41  ;;  %v1011_v47 = vadd.f32 %v1952_v6, %v672_v44 }
 0x169   : > { %v1043_v48 = vadd.f32 %v1952_v6, %v752_v45  ;;  %v1500_v49 = vpop.eup %1499  ;;  %1163 = vst [vmem:[%s1972_s24 + $0x158] sm:$0xff] %v1498_v46  ;;  %1525 = vtanh.f32 %v1042_v42  ;;  %v676_v50 = vpop.f32.mrf.mxu0 }
 0x16a   : > { %v756_v51 = vpop.f32.mrf.mxu1  ;;  %v1502_v52 = vpop.eup %1501  ;;  %1132 = vst [vmem:[%s1972_s24 + $0x60] sm:$0xff] %v1500_v49  ;;  %1527 = vtanh.f32 %v1011_v47  ;;  %v1012_v53 = vadd.f32 %v1950_v5, %v676_v50 }
 0x16b   : > { %v1044_v54 = vadd.f32 %v1950_v5, %v756_v51  ;;  %v1504_v55 = vpop.eup %1503  ;;  %1164 = vst [vmem:[%s1972_s24 + $0x160] sm:$0xff] %v1502_v52  ;;  %1529 = vtanh.f32 %v1043_v48  ;;  %v678_v56 = vpop.f32.mrf.mxu0 }
 0x16c   : > { %v758_v57 = vpop.f32.mrf.mxu1  ;;  %v1506_v58 = vpop.eup %1505  ;;  %1133 = vst [vmem:[%s1972_s24 + $0x68] sm:$0xff] %v1504_v55  ;;  %1531 = vtanh.f32 %v1012_v53  ;;  %v1013_v59 = vadd.f32 %v1952_v6, %v678_v56 }
 0x16d   : > { %v1045_v60 = vadd.f32 %v1952_v6, %v758_v57  ;;  %v1508_v61 = vpop.eup %1507  ;;  %1165 = vst [vmem:[%s1972_s24 + $0x168] sm:$0xff] %v1506_v58  ;;  %1533 = vtanh.f32 %v1044_v54  ;;  %v680_v62 = vpop.f32.mrf.mxu0 }
 0x16e   : > { %v760_v63 = vpop.f32.mrf.mxu1  ;;  %v1510_v0 = vpop.eup %1509  ;;  %1134 = vst [vmem:[%s1972_s24 + $0x70] sm:$0xff] %v1508_v61  ;;  %1535 = vtanh.f32 %v1013_v59  ;;  %v1014_v1 = vadd.f32 %v1950_v5, %v680_v62 }
 0x16f   : > { %v1046_v2 = vadd.f32 %v1950_v5, %v760_v63  ;;  %v1512_v3 = vpop.eup %1511  ;;  %1166 = vst [vmem:[%s1972_s24 + $0x170] sm:$0xff] %v1510_v0  ;;  %1537 = vtanh.f32 %v1045_v60  ;;  %v682_v4 = vpop.f32.mrf.mxu0 }
 0x170   : > { %v762_v7 = vpop.f32.mrf.mxu1  ;;  %v1514_v8 = vpop.eup %1513  ;;  %1135 = vst [vmem:[%s1972_s24 + $0x78] sm:$0xff] %v1512_v3  ;;  %1539 = vtanh.f32 %v1014_v1  ;;  %v1015_v9 = vadd.f32 %v1952_v6, %v682_v4 }
 0x171   : > { %v1047_v10 = vadd.f32 %v1952_v6, %v762_v7  ;;  %v1516_v11 = vpop.eup %1515  ;;  %1167 = vst [vmem:[%s1972_s24 + $0x178] sm:$0xff] %v1514_v8  ;;  %1541 = vtanh.f32 %v1046_v2  ;;  %v686_v12 = vpop.f32.mrf.mxu0 }
 0x172   : > { %v766_v13 = vpop.f32.mrf.mxu1  ;;  %v1518_v14 = vpop.eup %1517  ;;  %1136 = vst [vmem:[%s1972_s24 + $0x80] sm:$0xff] %v1516_v11  ;;  %1543 = vtanh.f32 %v1015_v9  ;;  %v1016_v15 = vadd.f32 %v1950_v5, %v686_v12 }
 0x173   : > { %v1048_v16 = vadd.f32 %v1950_v5, %v766_v13  ;;  %v1520_v17 = vpop.eup %1519  ;;  %1168 = vst [vmem:[%s1972_s24 + $0x180] sm:$0xff] %v1518_v14  ;;  %1545 = vtanh.f32 %v1047_v10  ;;  %v688_v18 = vpop.f32.mrf.mxu0 }
 0x174   : > { %v768_v19 = vpop.f32.mrf.mxu1  ;;  %v1522_v20 = vpop.eup %1521  ;;  %1137 = vst [vmem:[%s1972_s24 + $0x88] sm:$0xff] %v1520_v17  ;;  %1547 = vtanh.f32 %v1016_v15  ;;  %v1017_v21 = vadd.f32 %v1952_v6, %v688_v18 }
 0x175   : > { %v1049_v22 = vadd.f32 %v1952_v6, %v768_v19  ;;  %v1524_v23 = vpop.eup %1523  ;;  %1169 = vst [vmem:[%s1972_s24 + $0x188] sm:$0xff] %v1522_v20  ;;  %1549 = vtanh.f32 %v1048_v16  ;;  %v690_v24 = vpop.f32.mrf.mxu0 }
 0x176   : > { %v770_v25 = vpop.f32.mrf.mxu1  ;;  %v1526_v26 = vpop.eup %1525  ;;  %1138 = vst [vmem:[%s1972_s24 + $0x90] sm:$0xff] %v1524_v23  ;;  %1551 = vtanh.f32 %v1017_v21  ;;  %v1018_v27 = vadd.f32 %v1950_v5, %v690_v24 }
 0x177   : > { %v1050_v28 = vadd.f32 %v1950_v5, %v770_v25  ;;  %v1528_v29 = vpop.eup %1527  ;;  %1170 = vst [vmem:[%s1972_s24 + $0x190] sm:$0xff] %v1526_v26  ;;  %1553 = vtanh.f32 %v1049_v22  ;;  %v692_v30 = vpop.f32.mrf.mxu0 }
 0x178   : > { %v772_v31 = vpop.f32.mrf.mxu1  ;;  %v1530_v32 = vpop.eup %1529  ;;  %1139 = vst [vmem:[%s1972_s24 + $0x98] sm:$0xff] %v1528_v29  ;;  %1555 = vtanh.f32 %v1018_v27  ;;  %v1019_v33 = vadd.f32 %v1952_v6, %v692_v30 }
 0x179   : > { %v1051_v34 = vadd.f32 %v1952_v6, %v772_v31  ;;  %v1532_v35 = vpop.eup %1531  ;;  %1171 = vst [vmem:[%s1972_s24 + $0x198] sm:$0xff] %v1530_v32  ;;  %1557 = vtanh.f32 %v1050_v28  ;;  %v696_v36 = vpop.f32.mrf.mxu0 }
 0x17a   : > { %v776_v37 = vpop.f32.mrf.mxu1  ;;  %v1534_v38 = vpop.eup %1533  ;;  %1140 = vst [vmem:[%s1972_s24 + $0xa0] sm:$0xff] %v1532_v35  ;;  %1559 = vtanh.f32 %v1019_v33  ;;  %v1020_v39 = vadd.f32 %v1950_v5, %v696_v36 }
 0x17b   : > { %v1052_v40 = vadd.f32 %v1950_v5, %v776_v37  ;;  %v1536_v41 = vpop.eup %1535  ;;  %1172 = vst [vmem:[%s1972_s24 + $0x1a0] sm:$0xff] %v1534_v38  ;;  %1561 = vtanh.f32 %v1051_v34  ;;  %v698_v42 = vpop.f32.mrf.mxu0 }
 0x17c   : > { %v778_v43 = vpop.f32.mrf.mxu1  ;;  %v1538_v44 = vpop.eup %1537  ;;  %1141 = vst [vmem:[%s1972_s24 + $0xa8] sm:$0xff] %v1536_v41  ;;  %1563 = vtanh.f32 %v1020_v39  ;;  %v1021_v45 = vadd.f32 %v1952_v6, %v698_v42 }
 0x17d   : > { %v1053_v46 = vadd.f32 %v1952_v6, %v778_v43  ;;  %v1540_v47 = vpop.eup %1539  ;;  %1173 = vst [vmem:[%s1972_s24 + $0x1a8] sm:$0xff] %v1538_v44  ;;  %1565 = vtanh.f32 %v1052_v40  ;;  %v700_v48 = vpop.f32.mrf.mxu0 }
 0x17e   : > { %v780_v49 = vpop.f32.mrf.mxu1  ;;  %v1542_v50 = vpop.eup %1541  ;;  %1142 = vst [vmem:[%s1972_s24 + $0xb0] sm:$0xff] %v1540_v47  ;;  %1567 = vtanh.f32 %v1021_v45  ;;  %v1022_v51 = vadd.f32 %v1950_v5, %v700_v48 }
 0x17f   : > { %v1054_v52 = vadd.f32 %v1950_v5, %v780_v49  ;;  %v1544_v53 = vpop.eup %1543  ;;  %1174 = vst [vmem:[%s1972_s24 + $0x1b0] sm:$0xff] %v1542_v50  ;;  %1569 = vtanh.f32 %v1053_v46  ;;  %v702_v54 = vpop.f32.mrf.mxu0 }
 0x180   : > { %v782_v55 = vpop.f32.mrf.mxu1  ;;  %v1546_v56 = vpop.eup %1545  ;;  %1143 = vst [vmem:[%s1972_s24 + $0xb8] sm:$0xff] %v1544_v53  ;;  %1571 = vtanh.f32 %v1022_v51  ;;  %v1023_v57 = vadd.f32 %v1952_v6, %v702_v54 }
 0x181   : > { %v1055_v58 = vadd.f32 %v1952_v6, %v782_v55  ;;  %v1548_v59 = vpop.eup %1547  ;;  %1175 = vst [vmem:[%s1972_s24 + $0x1b8] sm:$0xff] %v1546_v56  ;;  %1573 = vtanh.f32 %v1054_v52 }
 0x182   : > { %v1550_v5 = vpop.eup %1549  ;;  %1144 = vst [vmem:[%s1972_s24 + $0xc0] sm:$0xff] %v1548_v59  ;;  %1575 = vtanh.f32 %v1023_v57 }
 0x183   : > { %v1552_v60 = vpop.eup %1551  ;;  %1176 = vst [vmem:[%s1972_s24 + $0x1c0] sm:$0xff] %v1550_v5  ;;  %1577 = vtanh.f32 %v1055_v58 }
 0x184   : > { %v1554_v61 = vpop.eup %1553  ;;  %1145 = vst [vmem:[%s1972_s24 + $0xc8] sm:$0xff] %v1552_v60 }
 0x185   : > { %v1556_v62 = vpop.eup %1555  ;;  %1177 = vst [vmem:[%s1972_s24 + $0x1c8] sm:$0xff] %v1554_v61 }
 0x186   : > { %v1558_v6 = vpop.eup %1557  ;;  %1146 = vst [vmem:[%s1972_s24 + $0xd0] sm:$0xff] %v1556_v62 }
 0x187   : > { %v1560_v63 = vpop.eup %1559  ;;  %1178 = vst [vmem:[%s1972_s24 + $0x1d0] sm:$0xff] %v1558_v6 }
 0x188   : > { %v1562_v0 = vpop.eup %1561  ;;  %1147 = vst [vmem:[%s1972_s24 + $0xd8] sm:$0xff] %v1560_v63 }
 0x189   : > { %v1564_v1 = vpop.eup %1563  ;;  %1179 = vst [vmem:[%s1972_s24 + $0x1d8] sm:$0xff] %v1562_v0 }
 0x18a   : > { %v1566_v2 = vpop.eup %1565  ;;  %1148 = vst [vmem:[%s1972_s24 + $0xe0] sm:$0xff] %v1564_v1 }
 0x18b   : > { %v1568_v3 = vpop.eup %1567  ;;  %1180 = vst [vmem:[%s1972_s24 + $0x1e0] sm:$0xff] %v1566_v2 }
 0x18c   : > { %v1570_v4 = vpop.eup %1569  ;;  %1149 = vst [vmem:[%s1972_s24 + $0xe8] sm:$0xff] %v1568_v3 }
 0x18d   : > { %v1572_v7 = vpop.eup %1571  ;;  %1181 = vst [vmem:[%s1972_s24 + $0x1e8] sm:$0xff] %v1570_v4 }
 0x18e   : > { %v1574_v8 = vpop.eup %1573  ;;  %1150 = vst [vmem:[%s1972_s24 + $0xf0] sm:$0xff] %v1572_v7 }
 0x18f   : > { %v1576_v9 = vpop.eup %1575  ;;  %1182 = vst [vmem:[%s1972_s24 + $0x1f0] sm:$0xff] %v1574_v8 }
 0x190   : > { %v1578_v10 = vpop.eup %1577  ;;  %1151 = vst [vmem:[%s1972_s24 + $0xf8] sm:$0xff] %v1576_v9 }
 0x191   : > { %1183 = vst [vmem:[%s1972_s24 + $0x1f8] sm:$0xff] %v1578_v10 }
 0x192   : > { %1646 = shalt.err (!%p1643_p5)
}
 0x193   : > { %s1647_s18 = scalar_lea.hbm %s2088_s21, 8192  ;;  %s1651_s27 = scalar_lea.hbm %s2144_s3, 16384 }
 0x194   : > { %p1648_p7 = scmp.ne.s32.totalorder %s2088_s21, %s1647_s18  ;;  %p1652_p9 = scmp.lt.s32.totalorder %s2088_s21, %s2144_s3 }
 0x195   : > { %p1653_p11 = scmp.lt.s32.totalorder %s1651_s27, %s1647_s18 }
 0x196   : > { %p1649_p4 = pnand %p1648_p7, %p1836_p13 }
 0x197   : > { %p1654_p10 = por %p1653_p11, %p1652_p9 }
 0x198   : > { %p1650_p6 = pneg %p1649_p4 }
 0x19a   : > { %p1655_p1 = pnand %p1654_p10, %p1650_p6 }
 0x19c   : > { %1658 = shalt.err (!%p1655_p1)
}
 0x19d   : > { %s1724_s24 = smov 256   ;;  %s1725_s30 = smov 16  }
 0x19e   : > { %1380 = dma.vmem_to_hbm [thread:$0]  (%p1836_p13), %s2090_s29, 8192, %s2088_s21, %s1185_s15, %s1724_s24, %s1724_s24, %s1725_s30  }
 0x19f PF: > { %s1216_s5 = sand.u32 1, %s1697_s12   ;;  %p2160_p8 = scmp.ne.s32.totalorder %s2151_s23, 0 }
 0x1a0   : > { %p2161_p12 = scmp.ge.s32.totalorder %s1717_s17, 2  ;;  %s1217_s6 = scalar_lea.sflag [#allocation5], %s1216_s5 }
 0x1a2   : > { %p1391_p0 = pnand %p2161_p12, %p2160_p8 }
 0x1a4   : > { %p1392_p2 = pneg %p1391_p0 }
 0x1a6   : > { %1692 = dma.done.wait (%p1392_p2), %s1217_s6, 8192  }
 0x1a7   : > { %1694 = vsyncadd (%p1392_p2), %s1217_s6, 4294959104  ;;  %s20_s17 = sadd.s32 1, %s1717_s17   ;;  %s2162_s12 = smov %s1701_s13 }
 0x1a8   : > { %p17_p3 = scmp.ge.s32.totalorder %s20_s17, 4   ;;  %s2163_s13 = smov %s1705_s14 }
 0x1a9   : > { %s2164_s14 = smov %s1845_s19  ;;  %s2165_s15 = smov %s1713_s16 }
 0x1aa   : > { %s2166_s16 = smov %s2168_s28  ;;  %19 = sbr.rel (!%p17_p3) target bundleno = 7 (0x7), region = 93 }
 0x1af   :  { %1222 = vsyncpa [#allocation4], 1 }
 0x1b0   :  { %1224 = vsyncpa [#allocation4 + $0x1], 1 }
 0x1b1   :  { %1225 = vsyncpa [#allocation7], 1 }
 0x1b2   :  { %1226 = vsyncpa [#allocation5], 1 }
 0x1b3   :  { %1228 = vsyncpa [#allocation5 + $0x1], 1 }

</bundles_post_ra>
